<compile_context>
chip_gen: v7x
topology: tpu7x:2x2x1
jax: 0.10.0
libtpu: 0.0.40
codegen_flags: <defaults>
</compile_context>

<pallas_src>
import functools
import math
import re

import jax
import jax.numpy as jnp
from jax.experimental import pallas as pl
from jax.experimental.pallas import tpu as pltpu


def _round_up(x, m):
    return ((x + m - 1) // m) * m


def _gelu_exact(x):
    # PyTorch nn.GELU() default = exact (erf-based) GELU; evaluated in f32.
    return 0.5 * x * (1.0 + jax.lax.erf(x * (1.0 / math.sqrt(2.0))))


@functools.lru_cache(maxsize=1)
def _hw_info():
    """Generation-aware sizing hints (VMEM budget, padding granule, token tile)."""
    vmem_cap = None
    try:
        vmem_cap = int(pltpu.get_tpu_info().vmem_capacity_bytes)
    except Exception:
        vmem_cap = None
    gen = 0
    try:
        kind = jax.devices()[0].device_kind.lower()
        m = re.search(r"v(\d+)", kind)
        if m:
            gen = int(m.group(1))
    except Exception:
        gen = 0
    if vmem_cap is None:
        # v7x has 64 MiB per TensorCore; older generations 128 MiB.
        vmem_cap = (128 << 20) if 1 <= gen <= 6 else (64 << 20)
    vmem_budget = int(vmem_cap * 0.8)  # leave headroom for compiler scratch
    if gen >= 7:
        tm_default, feat_granule = 256, 256    # 64 MiB VMEM, 2x256 MXU
    elif gen == 6:
        tm_default, feat_granule = 1024, 256   # weight-stream roofline ~700 flop/B
    else:
        tm_default, feat_granule = 512, 128    # v5e-class (128x128 MXU) / unknown
    return dict(vmem_budget=vmem_budget, feat_granule=feat_granule,
                tm_default=tm_default, generation=gen)


def _shrink_tk(tk, hid_p, granule):
    """Largest multiple of `granule` below tk that still divides hid_p."""
    cand = tk - granule
    while cand >= granule:
        if hid_p % cand == 0:
            return cand
        cand -= granule
    return granule


def mlp_kernel(x_ref, w1_ref, b1_ref, w2_ref, b2_ref, o_ref, acc_ref=None, *,
               approx_gelu: bool = True):
    # Grid = (token_tiles [parallel], hid_chunks [arbitrary])
    # x_ref : (tm, in_p)        compute dtype (bf16 or f32)
    # w1_ref: (in_p, tk_hid)    compute dtype
    # b1_ref: (1, tk_hid)       f32
    # w2_ref: (tk_hid, out_p)   compute dtype
    # b2_ref: (1, out_p)        f32
    # o_ref : (tm, out_p)       output dtype (same block across all k -> resident)
    # acc_ref: optional (tm, out_p) f32 scratch; None when out dtype is f32
    #          (then we accumulate directly into o_ref).
    acc = o_ref if acc_ref is None else acc_ref
    k = pl.program_id(1)

    @pl.when(k == 0)
    def _init():
        acc[...] = jnp.zeros_like(acc)

    # fc1 on this hid chunk, f32 accumulation on the MXU.
    h = jnp.dot(x_ref[...], w1_ref[...], preferred_element_type=jnp.float32)
    h = h + b1_ref[...]
    if approx_gelu:
        h = jax.nn.gelu(h, approximate=True)   # tanh path -> EUP slot (perf default)
    else:
        h = _gelu_exact(h)                     # torch nn.GELU() exact parity
    # dropout p=0.0 -> identity (no-op)

    # Partial fc2 contribution of this hid chunk, accumulated in f32.
    acc[...] += jnp.dot(h.astype(w2_ref.dtype), w2_ref[...],
                        preferred_element_type=jnp.float32)

    @pl.when(k == pl.num_programs(1) - 1)
    def _finalize():
        o_ref[...] = (acc[...].astype(jnp.float32) + b2_ref[...]).astype(o_ref.dtype)


def prepare_mlp_params(w1, b1, w2, b2, *, compute_dtype=jnp.bfloat16,
                       tk_hid=None):
    """One-time (outside the hot path) pad + transpose + cast of torch-layout params.

    w1: (hid, in), b1: (hid,), w2: (out, hid), b2: (out,)  [torch nn.Linear layout]
    """
    hid_dim, in_dim = w1.shape
    out_dim, hid_dim2 = w2.shape
    assert hid_dim2 == hid_dim

    hw = _hw_info()
    granule = hw["feat_granule"]
    cdt = jnp.dtype(compute_dtype)
    c_item = cdt.itemsize

    in_p = _round_up(in_dim, granule)
    out_p = _round_up(out_dim, granule)
    hid_lane = _round_up(hid_dim, granule)

    if tk_hid is None:
        weight_bytes = (in_p * hid_lane + hid_lane * out_p) * c_item
        # Keep the whole hidden dim in one chunk (n_k = 1): the weight blocks
        # become grid-constant, are fetched ONCE per pallas_call and stay
        # VMEM-resident, instead of being re-streamed for every token tile.
        if 2 * weight_bytes <= int(hw["vmem_budget"] * 0.6):
            tk_hid = hid_lane
        else:
            tk_hid = 1024 if hw["generation"] >= 7 else 2048
    tk_hid = min(_round_up(tk_hid, granule), hid_lane)
    hid_p = _round_up(hid_dim, tk_hid)

    # Zero padding is exact: padded in columns contribute 0, padded hid columns
    # give GELU(0+0)=0 into zero fc2 rows, padded out columns are sliced off.
    w1t = jnp.zeros((in_p, hid_p), cdt).at[:in_dim, :hid_dim].set(w1.T.astype(cdt))
    w2t = jnp.zeros((hid_p, out_p), cdt).at[:hid_dim, :out_dim].set(w2.T.astype(cdt))
    b1r = jnp.zeros((1, hid_p), jnp.float32).at[:, :hid_dim].set(
        b1.astype(jnp.float32)[None, :])
    b2r = jnp.zeros((1, out_p), jnp.float32).at[:, :out_dim].set(
        b2.astype(jnp.float32)[None, :])

    return dict(w1t=w1t, b1=b1r, w2t=w2t, b2=b2r,
                in_dim=in_dim, hid_dim=hid_dim, out_dim=out_dim,
                in_p=in_p, hid_p=hid_p, out_p=out_p, tk_hid=tk_hid,
                compute_dtype=cdt)


def mlp_pallas(x, params, *, tm=None, approx_gelu=True):
    """x: (..., in_dim). params from prepare_mlp_params."""
    in_dim, out_dim = params["in_dim"], params["out_dim"]
    in_p, hid_p, out_p = params["in_p"], params["hid_p"], params["out_p"]
    tk = params["tk_hid"]
    cdt = params["compute_dtype"]

    assert x.shape[-1] == in_dim
    lead = x.shape[:-1]
    xm = x.reshape(-1, in_dim)
    M = xm.shape[0]

    hw = _hw_info()
    granule = hw["feat_granule"]
    budget = hw["vmem_budget"]

    out_dtype = x.dtype
    c_item = cdt.itemsize
    o_item = jnp.dtype(out_dtype).itemsize
    # f32 outputs accumulate directly into the (k-resident) output block;
    # only non-f32 outputs need a separate f32 scratch accumulator.
    use_acc_scratch = jnp.dtype(out_dtype) != jnp.dtype(jnp.float32)

    # Token tile: generation default, capped at M (no forced splitting of small
    # batches), rounded to the sublane packing of the compute dtype.
    tm_granule = 16 if c_item == 2 else 8
    if tm is None:
        tm = hw["tm_default"]
    tm = min(tm, _round_up(M, tm_granule))
    tm = max(tm_granule, _round_up(tm, tm_granule))

    def vmem_est(tm_, tk_):
        blocks = (tm_ * in_p * c_item + in_p * tk_ * c_item + tk_ * 4
                  + tk_ * out_p * c_item + out_p * 4 + tm_ * out_p * o_item)
        e = 2 * blocks                     # double-buffered pipeline blocks
        if use_acc_scratch:
            e += tm_ * out_p * 4
        return e

    # If the working set exceeds this generation's budget, shrink tiles instead
    # of clamping vmem_limit_bytes below the real requirement.
    while vmem_est(tm, tk) > budget:
        if tm > 256:
            tm = max(256, _round_up(tm // 2, tm_granule))
        elif tk > granule:
            tk = _shrink_tk(tk, hid_p, granule)
        elif tm > tm_granule:
            tm = max(tm_granule, _round_up(tm // 2, tm_granule))
        else:
            break

    m_p = _round_up(M, tm)
    n_tok = m_p // tm
    n_k = hid_p // tk

    # Pad tokens + features and cast activations to the MXU dtype once.
    xp = jnp.zeros((m_p, in_p), cdt).at[:M, :in_dim].set(xm.astype(cdt))

    # Cost estimate (advisory, for XLA's scheduler around the custom call).
    weight_bytes = (in_p * hid_p + hid_p * out_p) * c_item + (hid_p + out_p) * 4
    weight_reads = 1 if n_k == 1 else n_tok   # grid-constant blocks fetched once
    cost = pl.CostEstimate(
        flops=2 * m_p * hid_p * (in_p + out_p),
        transcendentals=m_p * hid_p,
        bytes_accessed=m_p * in_p * c_item + m_p * out_p * o_item
                       + weight_reads * weight_bytes)

    est = vmem_est(tm, tk)
    vmem_limit = int(min(budget, max(est * 3 // 2, 32 << 20)))

    kernel = functools.partial(mlp_kernel, approx_gelu=approx_gelu)
    scratch = [pltpu.VMEM((tm, out_p), jnp.float32)] if use_acc_scratch else []

    out = pl.pallas_call(
        kernel,
        out_shape=jax.ShapeDtypeStruct((m_p, out_p), out_dtype),
        grid_spec=pltpu.PrefetchScalarGridSpec(
            num_scalar_prefetch=0,
            grid=(n_tok, n_k),
            in_specs=[
                pl.BlockSpec((tm, in_p), lambda i, k: (i, 0)),
                pl.BlockSpec((in_p, tk), lambda i, k: (0, k)),
                pl.BlockSpec((1, tk), lambda i, k: (0, k)),
                pl.BlockSpec((tk, out_p), lambda i, k: (k, 0)),
                pl.BlockSpec((1, out_p), lambda i, k: (0, 0)),
            ],
            out_specs=pl.BlockSpec((tm, out_p), lambda i, k: (i, 0)),
            scratch_shapes=scratch,
        ),
        compiler_params=pltpu.CompilerParams(
            dimension_semantics=("parallel", "arbitrary"),
            vmem_limit_bytes=vmem_limit),
        cost_estimate=cost,
    )(xp, params["w1t"], params["b1"], params["w2t"], params["b2"])

    return out[:M, :out_dim].reshape(*lead, out_dim)


def mlp_reference(x, w1, b1, w2, b2):
    h = jnp.einsum("...i,hi->...h", x, w1) + b1
    h = _gelu_exact(h)
    return jnp.einsum("...h,oh->...o", h, w2) + b2


if __name__ == "__main__":
    key = jax.random.PRNGKey(0)

    def make_params(k, in_dim, hid_dim, out_dim):
        kw1, kb1, kw2, kb2 = jax.random.split(k, 4)
        lim1 = 1.0 / math.sqrt(in_dim)
        lim2 = 1.0 / math.sqrt(hid_dim)
        w1 = jax.random.uniform(kw1, (hid_dim, in_dim), jnp.float32, -lim1, lim1)
        b1 = jax.random.uniform(kb1, (hid_dim,), jnp.float32, -lim1, lim1)
        w2 = jax.random.uniform(kw2, (out_dim, hid_dim), jnp.float32, -lim2, lim2)
        b2 = jax.random.uniform(kb2, (out_dim,), jnp.float32, -lim2, lim2)
        return w1, b1, w2, b2

    # ---- Case 1: Mlp(32, 64, 32) on (2, 8, 32) (the torch-demo shape). ----
    k0, k1, k2 = jax.random.split(key, 3)
    batch, seq, in_dim, hid_dim, out_dim = 2, 8, 32, 64, 32
    x = jax.random.normal(k0, (batch, seq, in_dim), dtype=jnp.float32)
    w1, b1, w2, b2 = make_params(k1, in_dim, hid_dim, out_dim)
    y_ref = mlp_reference(x, w1, b1, w2, b2)

    # Exact-parity path: f32 compute + erf GELU (== torch nn.GELU() default).
    p_f32 = prepare_mlp_params(w1, b1, w2, b2, compute_dtype=jnp.float32)
    y_f32 = jax.block_until_ready(mlp_pallas(x, p_f32, approx_gelu=False))
    assert y_f32.shape == (batch, seq, out_dim)
    assert jnp.allclose(y_f32, y_ref, atol=1e-5, rtol=1e-5), "f32/erf mismatch"

    # Multi-token-tile path (n_tok > 1) with grid-constant, VMEM-resident weights.
    y_tm8 = jax.block_until_ready(mlp_pallas(x, p_f32, tm=8, approx_gelu=False))
    assert jnp.allclose(y_tm8, y_ref, atol=1e-5, rtol=1e-5), "tm=8 mismatch"

    # Performance default: bf16 MXU inputs, f32 accumulation, tanh GELU.
    p_bf16 = prepare_mlp_params(w1, b1, w2, b2, compute_dtype=jnp.bfloat16)
    y_bf16 = jax.block_until_ready(mlp_pallas(x, p_bf16))
    assert y_bf16.shape == (batch, seq, out_dim)
    assert jnp.allclose(y_bf16, y_ref, atol=5e-2, rtol=5e-2), "bf16 mismatch"

    # bf16 activations in/out -> exercises the f32 VMEM scratch accumulator path.
    xb = x.astype(jnp.bfloat16)
    y_bb = jax.block_until_ready(mlp_pallas(xb, p_bf16))
    assert y_bb.dtype == jnp.bfloat16
    y_ref_b = mlp_reference(xb.astype(jnp.float32), w1, b1, w2, b2)
    assert jnp.allclose(y_bb.astype(jnp.float32), y_ref_b, atol=1e-1, rtol=1e-1), \
        "bf16-io mismatch"

    # ---- Case 2: streamed hidden axis (n_k > 1) via a forced small tk_hid. ----
    in2, hid2, out2, m2 = 64, 512, 64, 32
    k3, k4 = jax.random.split(k2)
    x2 = jax.random.normal(k3, (m2, in2), dtype=jnp.float32)
    w1b, b1b, w2b, b2b = make_params(k4, in2, hid2, out2)
    p2 = prepare_mlp_params(w1b, b1b, w2b, b2b, compute_dtype=jnp.float32,
                            tk_hid=256)
    assert p2["hid_p"] // p2["tk_hid"] > 1      # really exercises the k loop
    y2 = jax.block_until_ready(mlp_pallas(x2, p2, approx_gelu=False))
    y2_ref = mlp_reference(x2, w1b, b1b, w2b, b2b)
    assert jnp.allclose(y2, y2_ref, atol=1e-4, rtol=1e-4), "streamed-k mismatch"

    print("KERNEL_OK")
</pallas_src>

<mosaic_0001>
module attributes {stable_mosaic.version = 11 : i64} {
  func.func @mlp_kernel(%arg0: i32, %arg1: i32, %arg2: memref<16x128xf32, #tpu.memory_space<vmem>>, %arg3: memref<128x128xf32, #tpu.memory_space<vmem>>, %arg4: memref<1x128xf32, #tpu.memory_space<vmem>>, %arg5: memref<128x128xf32, #tpu.memory_space<vmem>>, %arg6: memref<1x128xf32, #tpu.memory_space<vmem>>, %arg7: memref<16x128xf32, #tpu.memory_space<vmem>>) attributes {dimension_semantics = [#tpu.dimension_semantics<parallel>, #tpu.dimension_semantics<arbitrary>], iteration_bounds = array<i64: 1, 1>, scalar_prefetch = 0 : i64, scratch_operands = 0 : i64, tpu.core_type = #tpu.core_type<tc>, window_params = [{transform_indices = @transform_0, window_bounds = array<i64: 16, 128>}, {transform_indices = @transform_1, window_bounds = array<i64: 128, 128>}, {transform_indices = @transform_2, window_bounds = array<i64: 1, 128>}, {transform_indices = @transform_3, window_bounds = array<i64: 128, 128>}, {pipeline_mode = #tpu.pipeline_mode<synchronous>, transform_indices = @transform_4, window_bounds = array<i64: 1, 128>}, {transform_indices = @transform_5, window_bounds = array<i64: 16, 128>}]} {
    %c0_i32 = arith.constant 0 : i32
    %0 = arith.cmpi eq, %arg1, %c0_i32 : i32
    %1 = arith.extui %0 : i1 to i32
    %c0_i32_0 = arith.constant 0 : i32
    %2 = arith.cmpi ne, %1, %c0_i32_0 : i32
    scf.if %2 {
      %cst_18 = arith.constant 0.000000e+00 : f32
      %25 = vector.broadcast %cst_18 : f32 to vector<16x128xf32>
      %c0_19 = arith.constant 0 : index
      %c0_20 = arith.constant 0 : index
      %26 = vector.load %arg7[%c0_19, %c0_20] : memref<16x128xf32, #tpu.memory_space<vmem>>, vector<16x128xf32>
      tpu.vector_store %arg7[%c0_19, %c0_20], %25 {strides = array<i32>} : memref<16x128xf32, #tpu.memory_space<vmem>>, vector<16x128xf32>,
    } else {
    }
    %c0 = arith.constant 0 : index
    %c0_1 = arith.constant 0 : index
    %3 = vector.load %arg2[%c0, %c0_1] : memref<16x128xf32, #tpu.memory_space<vmem>>, vector<16x128xf32>
    %c0_2 = arith.constant 0 : index
    %c0_3 = arith.constant 0 : index
    %4 = vector.load %arg3[%c0_2, %c0_3] : memref<128x128xf32, #tpu.memory_space<vmem>>, vector<128x128xf32>
    %cst = arith.constant dense<0.000000e+00> : vector<16x128xf32>
    %5 = tpu.matmul %3, %4, %cst {dimension_numbers = #tpu.dot_dimension_numbers<[1], [0], [0], [1], [0, 0, 1, 1], [], []>} : vector<16x128xf32>, vector<128x128xf32>, vector<16x128xf32> -> vector<16x128xf32>
    %c0_4 = arith.constant 0 : index
    %c0_5 = arith.constant 0 : index
    %6 = vector.load %arg4[%c0_4, %c0_5] : memref<1x128xf32, #tpu.memory_space<vmem>>, vector<1x128xf32>
    %7 = vector.broadcast %6 : vector<1x128xf32> to vector<16x128xf32>
    %8 = arith.addf %5, %7 : vector<16x128xf32>
    %cst_6 = arith.constant 5.000000e-01 : f32
    %9 = vector.broadcast %cst_6 : f32 to vector<16x128xf32>
    %10 = arith.mulf %9, %8 : vector<16x128xf32>
    %cst_7 = arith.constant 0.707106769 : f32
    %11 = vector.broadcast %cst_7 : f32 to vector<16x128xf32>
    %12 = arith.mulf %8, %11 : vector<16x128xf32>
    %13 = math.erf %12 : vector<16x128xf32>
    %cst_8 = arith.constant 1.000000e+00 : f32
    %14 = vector.broadcast %cst_8 : f32 to vector<16x128xf32>
    %15 = arith.addf %14, %13 : vector<16x128xf32>
    %16 = arith.mulf %10, %15 : vector<16x128xf32>
    %c0_9 = arith.constant 0 : index
    %c0_10 = arith.constant 0 : index
    %17 = vector.load %arg7[%c0_9, %c0_10] : memref<16x128xf32, #tpu.memory_space<vmem>>, vector<16x128xf32>
    %c0_11 = arith.constant 0 : index
    %c0_12 = arith.constant 0 : index
    %18 = vector.load %arg5[%c0_11, %c0_12] : memref<128x128xf32, #tpu.memory_space<vmem>>, vector<128x128xf32>
    %cst_13 = arith.constant dense<0.000000e+00> : vector<16x128xf32>
    %19 = tpu.matmul %16, %18, %cst_13 {dimension_numbers = #tpu.dot_dimension_numbers<[1], [0], [0], [1], [0, 0, 1, 1], [], []>} : vector<16x128xf32>, vector<128x128xf32>, vector<16x128xf32> -> vector<16x128xf32>
    %20 = arith.addf %17, %19 : vector<16x128xf32>
    %c0_14 = arith.constant 0 : index
    %c0_15 = arith.constant 0 : index
    %21 = vector.load %arg7[%c0_14, %c0_15] : memref<16x128xf32, #tpu.memory_space<vmem>>, vector<16x128xf32>
    tpu.vector_store %arg7[%c0_14, %c0_15], %20 {strides = array<i32>} : memref<16x128xf32, #tpu.memory_space<vmem>>, vector<16x128xf32>,
    %c0_i32_16 = arith.constant 0 : i32
    %22 = arith.cmpi eq, %arg1, %c0_i32_16 : i32
    %23 = arith.extui %22 : i1 to i32
    %c0_i32_17 = arith.constant 0 : i32
    %24 = arith.cmpi ne, %23, %c0_i32_17 : i32
    scf.if %24 {
      %c0_18 = arith.constant 0 : index
      %c0_19 = arith.constant 0 : index
      %25 = vector.load %arg7[%c0_18, %c0_19] : memref<16x128xf32, #tpu.memory_space<vmem>>, vector<16x128xf32>
      %c0_20 = arith.constant 0 : index
      %c0_21 = arith.constant 0 : index
      %26 = vector.load %arg6[%c0_20, %c0_21] : memref<1x128xf32, #tpu.memory_space<vmem>>, vector<1x128xf32>
      %27 = vector.broadcast %26 : vector<1x128xf32> to vector<16x128xf32>
      %28 = arith.addf %25, %27 : vector<16x128xf32>
      %c0_22 = arith.constant 0 : index
      %c0_23 = arith.constant 0 : index
      %29 = vector.load %arg7[%c0_22, %c0_23] : memref<16x128xf32, #tpu.memory_space<vmem>>, vector<16x128xf32>
      tpu.vector_store %arg7[%c0_22, %c0_23], %28 {strides = array<i32>} : memref<16x128xf32, #tpu.memory_space<vmem>>, vector<16x128xf32>,
    } else {
    }
    return
  }
  func.func @transform_0(%arg0: i32, %arg1: i32) -> (i32, i32) {
    %c0_i32 = arith.constant 0 : i32
    %c0_i32_0 = arith.constant 0 : i32
    return %arg0, %c0_i32 : i32, i32
  }
  func.func @transform_1(%arg0: i32, %arg1: i32) -> (i32, i32) {
    %c0_i32 = arith.constant 0 : i32
    %c0_i32_0 = arith.constant 0 : i32
    return %c0_i32, %arg1 : i32, i32
  }
  func.func @transform_2(%arg0: i32, %arg1: i32) -> (i32, i32) {
    %c0_i32 = arith.constant 0 : i32
    %c0_i32_0 = arith.constant 0 : i32
    return %c0_i32, %arg1 : i32, i32
  }
  func.func @transform_3(%arg0: i32, %arg1: i32) -> (i32, i32) {
    %c0_i32 = arith.constant 0 : i32
    %c0_i32_0 = arith.constant 0 : i32
    return %arg1, %c0_i32 : i32, i32
  }
  func.func @transform_4(%arg0: i32, %arg1: i32) -> (i32, i32) {
    %c0_i32 = arith.constant 0 : i32
    %c0_i32_0 = arith.constant 0 : i32
    %c0_i32_1 = arith.constant 0 : i32
    return %c0_i32, %c0_i32_0 : i32, i32
  }
  func.func @transform_5(%arg0: i32, %arg1: i32) -> (i32, i32) {
    %c0_i32 = arith.constant 0 : i32
    %c0_i32_0 = arith.constant 0 : i32
    return %arg0, %c0_i32 : i32, i32
  }
}

</mosaic_0001>

<bundles_post_ra>
// kernel: tpu_custom_call.1
= control target key start
LH: loop header
LB: loop body
LE: loop exit
PB: predicated region body
PF: predicated region fallthrough
CT: control target
= control target key end

     0   :  { %10 = vsyncpa [#allocation3], 0  ;;  %s695_s0 = inlined_call_operand.hbm [shape: f32[16,128], index: 0, kind: input, shape index: {}]   ;;  %s696_s1 = inlined_call_operand.hbm [shape: f32[128,128], index: 1, kind: input, shape index: {}]   ;;  %s697_s2 = inlined_call_operand.vmem [shape: f32[1,128], index: 2, kind: input, shape index: {}]   ;;  %s698_s3 = inlined_call_operand.hbm [shape: f32[128,128], index: 3, kind: input, shape index: {}]   ;;  %s699_s4 = inlined_call_operand.vmem [shape: f32[1,128], index: 4, kind: input, shape index: {}]   ;;  %s700_s5 = inlined_call_operand.hbm [shape: f32[16,128], index: 5, kind: output, shape index: {}]  }
   0x1   :  { %11 = vsyncpa [#allocation6], 0 }
   0x2   :  { %12 = vsyncpa [#allocation4], 0  ;;  %s586_s18 = smov [#allocation5]   ;;  %s587_s20 = smov [#allocation2]  }
   0x3   :  { %s30_s19 = sshll.u32 %s586_s18, 4  ;;  %s18_s21 = sshll.u32 %s587_s20, 4  ;;  %s31_s19 = int_to_ptr.vmem [resolvable:$true] %s30_s19  ;;  %s622_s21 = int_to_ptr.vmem [resolvable:$true] %s18_s21 }
   0x4   :  { %s492_s24 = scalar_lea.hbm %s696_s1, 2048 }
   0x5   :  { %p493_p0 = scmp.ne.s32.totalorder %s696_s1, %s492_s24  ;;  %p496_p1 = scmp.lt.u32.totalorder %s492_s24, %s696_s1 }
   0x7   :  { %p498_p2 = pnand %p496_p1, %p493_p0 }
   0x9   :  { %501 = shalt.err (!%p498_p2)
}
   0xa   :  { %s502_s29 = scalar_lea.vmem %s31_s19, 2048  ;;  %p507_p4 = scmp.lt.s32.totalorder %s31_s19, %s31_s19 }
   0xb   :  { %p503_p3 = scmp.ne.s32.totalorder %s31_s19, %s502_s29  ;;  %p508_p5 = scmp.lt.s32.totalorder %s502_s29, %s502_s29 }
   0xd   :  { %p509_p6 = por %p508_p5, %p507_p4 }
   0xf   :  { %p510_p7 = pnand %p509_p6, %p503_p3 }
  0x11   :  { %513 = shalt.err (!%p510_p7)
}
  0x12   :  { %s588_s30 = smov 128   ;;  %s589_s6 = smov 8  }
  0x13   :  { %36 = dma.hbm_to_vmem [thread:$0]  %s696_s1, 2048, %s31_s19, [#allocation6], %s588_s30, %s588_s30, %s589_s6  }
  0x14   :  { %s514_s11 = scalar_lea.hbm %s695_s0, 256 }
  0x15   :  { %p515_p8 = scmp.ne.s32.totalorder %s695_s0, %s514_s11  ;;  %p518_p9 = scmp.lt.u32.totalorder %s514_s11, %s695_s0 }
  0x17   :  { %p520_p10 = pnand %p518_p9, %p515_p8 }
  0x19   :  { %523 = shalt.err (!%p520_p10)
}
  0x1a   :  { %s524_s16 = scalar_lea.vmem %s622_s21, 256  ;;  %p529_p12 = scmp.lt.s32.totalorder %s622_s21, %s622_s21 }
  0x1b   :  { %p525_p11 = scmp.ne.s32.totalorder %s622_s21, %s524_s16  ;;  %p530_p13 = scmp.lt.s32.totalorder %s524_s16, %s524_s16 }
  0x1d   :  { %p531_p0 = por %p530_p13, %p529_p12 }
  0x1f   :  { %p532_p1 = pnand %p531_p0, %p525_p11 }
  0x21   :  { %535 = shalt.err (!%p532_p1)
}
  0x22   :  { %24 = dma.hbm_to_vmem [thread:$0]  %s695_s0, 256, %s622_s21, [#allocation3], %s588_s30, %s588_s30, %s589_s6  }
  0x23   :  { %s590_s18 = smov [#allocation7]   ;;  %s536_s23 = scalar_lea.hbm %s698_s3, 2048 }
  0x24   :  { %s44_s19 = sshll.u32 %s590_s18, 4  ;;  %p537_p2 = scmp.ne.s32.totalorder %s698_s3, %s536_s23  ;;  %s45_s19 = int_to_ptr.vmem [resolvable:$true] %s44_s19 }
  0x25   :  { %p540_p3 = scmp.lt.u32.totalorder %s536_s23, %s698_s3 }
  0x27   :  { %p542_p4 = pnand %p540_p3, %p537_p2 }
  0x29   :  { %545 = shalt.err (!%p542_p4)
}
  0x2a   :  { %s546_s28 = scalar_lea.vmem %s45_s19, 2048  ;;  %p551_p6 = scmp.lt.s32.totalorder %s45_s19, %s45_s19 }
  0x2b   :  { %p547_p5 = scmp.ne.s32.totalorder %s45_s19, %s546_s28  ;;  %p552_p7 = scmp.lt.s32.totalorder %s546_s28, %s546_s28 }
  0x2d   :  { %p553_p8 = por %p552_p7, %p551_p6 }
  0x2f   :  { %p554_p9 = pnand %p553_p8, %p547_p5 }
  0x31   :  { %557 = shalt.err (!%p554_p9)
}
  0x32   :  { %50 = dma.hbm_to_vmem [thread:$0]  %s698_s3, 2048, %s45_s19, [#allocation6], %s588_s30, %s588_s30, %s589_s6  }
  0x33   :  { %580 = dma.done.wait [#allocation3], 256  }
  0x34   :  { %581 = vsyncadd [#allocation3], 4294967040 }
  0x35   :  { %582 = dma.done.wait [#allocation6], 4096  }
  0x36   :  { %583 = vsyncadd [#allocation6], 4294963200  ;;  %v70_v0 = vld [vmem:[#allocation5] sm:$0xff]  ;;  %v71_v1 = vld [vmem:[#allocation5 + $0x8] sm:$0xff]  ;;  %s591_s8 = smov [#allocation8]  }
  0x37   :  { %v72_v2 = vld [vmem:[#allocation5 + $0x10] sm:$0xff]  ;;  %v417_v3 = vpack.c.bf16 %v71_v1, %v70_v0  ;;  %v73_v4 = vld [vmem:[#allocation5 + $0x18] sm:$0xff]  ;;  %v74_v6 = vld [vmem:[#allocation5 + $0x20] sm:$0xff]  ;;  %s296_s9 = sshll.u32 %s591_s8, 4  ;;  %s297_s9 = int_to_ptr.vmem [resolvable:$true] %s296_s9 }
  0x38   :  { %v421_v5 = vpack.c.bf16 %v73_v4, %v72_v2  ;;  %v75_v7 = vld [vmem:[#allocation5 + $0x28] sm:$0xff]  ;;  %v76_v9 = vld [vmem:[#allocation5 + $0x30] sm:$0xff]  ;;  %v77_v10 = vld [vmem:[#allocation5 + $0x38] sm:$0xff]  ;;  %s558_s10 = scalar_lea.vmem %s297_s9, 256  ;;  %p563_p11 = scmp.lt.s32.totalorder %s297_s9, %s297_s9 }
  0x39   :  { %418 = vmatprep.subr.bf16.mxu0 %v417_v3  ;;  %v425_v8 = vpack.c.bf16 %v75_v7, %v74_v6  ;;  %v68_v11 = vld [vmem:[#allocation2] sm:$0xff]  ;;  %v180_v12 = vld [vmem:[#allocation7] sm:$0xff]  ;;  %v181_v13 = vld [vmem:[#allocation7 + $0x8] sm:$0xff]  ;;  %v429_v20 = vpack.c.bf16 %v77_v10, %v76_v9  ;;  %p559_p10 = scmp.ne.s32.totalorder %s297_s9, %s558_s10  ;;  %p564_p12 = scmp.lt.s32.totalorder %s558_s10, %s558_s10 }
  0x3a   :  { %420 = vmatpush3.bf16.msra.mxu0 %v417_v3  ;;  %379 = vmatprep.mubr.f32.mxu0 %v68_v11  ;;  %v182_v14 = vld [vmem:[#allocation7 + $0x10] sm:$0xff]  ;;  %v449_v15 = vpack.c.bf16 %v181_v13, %v180_v12  ;;  %v183_v16 = vld [vmem:[#allocation7 + $0x18] sm:$0xff]  ;;  %v184_v18 = vld [vmem:[#allocation7 + $0x20] sm:$0xff] }
  0x3b   :  { %422 = vmatprep.subr.bf16.mxu0 %v421_v5  ;;  %v453_v17 = vpack.c.bf16 %v183_v16, %v182_v14  ;;  %v185_v19 = vld [vmem:[#allocation7 + $0x28] sm:$0xff]  ;;  %v78_v21 = vld [vmem:[#allocation5 + $0x40] sm:$0xff]  ;;  %v80_v25 = vld [vmem:[#allocation5 + $0x50] sm:$0xff]  ;;  %p565_p13 = por %p564_p12, %p563_p11 }
  0x3c   :  { %450 = vmatprep.subr.bf16.mxu1 %v449_v15  ;;  %v79_v22 = vld [vmem:[#allocation5 + $0x48] sm:$0xff]  ;;  %v457_v23 = vpack.c.bf16 %v185_v19, %v184_v18  ;;  %v81_v26 = vld [vmem:[#allocation5 + $0x58] sm:$0xff]  ;;  %v82_v28 = vld [vmem:[#allocation5 + $0x60] sm:$0xff] }
  0x3d   :  { %452 = vmatpush3.bf16.msra.mxu1 %v449_v15  ;;  %v433_v24 = vpack.c.bf16 %v79_v22, %v78_v21  ;;  %v437_v27 = vpack.c.bf16 %v81_v26, %v80_v25  ;;  %v83_v29 = vld [vmem:[#allocation5 + $0x68] sm:$0xff]  ;;  %v84_v31 = vld [vmem:[#allocation5 + $0x70] sm:$0xff]  ;;  %v85_v32 = vld [vmem:[#allocation5 + $0x78] sm:$0xff]  ;;  %p566_p0 = pnand %p565_p13, %p559_p10 }
  0x3e   :  { %424 = vmatpush3.bf16.msra.mxu0 %v421_v5  ;;  %454 = vmatprep.subr.bf16.mxu1 %v453_v17  ;;  %v441_v30 = vpack.c.bf16 %v83_v29, %v82_v28  ;;  %v445_v33 = vpack.c.bf16 %v85_v32, %v84_v31  ;;  %v69_v34 = vld [vmem:[#allocation2 + $0x8] sm:$0xff]  ;;  %v186_v35 = vld [vmem:[#allocation7 + $0x30] sm:$0xff]  ;;  %v188_v38 = vld [vmem:[#allocation7 + $0x40] sm:$0xff] }
  0x3f   :  { %426 = vmatprep.subr.bf16.mxu0 %v425_v8  ;;  %v187_v36 = vld [vmem:[#allocation7 + $0x38] sm:$0xff]  ;;  %v189_v39 = vld [vmem:[#allocation7 + $0x48] sm:$0xff]  ;;  %v190_v41 = vld [vmem:[#allocation7 + $0x50] sm:$0xff] }
  0x40   :  { %v461_v37 = vpack.c.bf16 %v187_v36, %v186_v35  ;;  %v465_v40 = vpack.c.bf16 %v189_v39, %v188_v38  ;;  %v191_v42 = vld [vmem:[#allocation7 + $0x58] sm:$0xff]  ;;  %v192_v44 = vld [vmem:[#allocation7 + $0x60] sm:$0xff]  ;;  %v193_v45 = vld [vmem:[#allocation7 + $0x68] sm:$0xff] }
  0x41   :  { %456 = vmatpush3.bf16.msra.mxu1 %v453_v17  ;;  %v469_v43 = vpack.c.bf16 %v191_v42, %v190_v41  ;;  %v473_v46 = vpack.c.bf16 %v193_v45, %v192_v44  ;;  %v194_v47 = vld [vmem:[#allocation7 + $0x70] sm:$0xff]  ;;  %v195_v48 = vld [vmem:[#allocation7 + $0x78] sm:$0xff] }
  0x42   :  { %428 = vmatpush3.bf16.msra.mxu0 %v425_v8  ;;  %458 = vmatprep.subr.bf16.mxu1 %v457_v23  ;;  %v477_v49 = vpack.c.bf16 %v195_v48, %v194_v47  ;;  %v309_v50 = vld [vmem:[%s697_s2] ss:$0 sm:$0xff] }
  0x43   :  { %430 = vmatprep.subr.bf16.mxu0 %v429_v20  ;;  %v310_v2 = vld [vmem:[%s699_s4] ss:$0 sm:$0xff] }
  0x45   :  { %460 = vmatpush3.bf16.msra.mxu1 %v457_v23 }
  0x46   :  { %432 = vmatpush3.bf16.msra.mxu0 %v429_v20  ;;  %462 = vmatprep.subr.bf16.mxu1 %v461_v37 }
  0x47   :  { %434 = vmatprep.subr.bf16.mxu0 %v433_v24 }
  0x49   :  { %464 = vmatpush3.bf16.msra.mxu1 %v461_v37 }
  0x4a   :  { %436 = vmatpush3.bf16.msra.mxu0 %v433_v24  ;;  %466 = vmatprep.subr.bf16.mxu1 %v465_v40 }
  0x4b   :  { %438 = vmatprep.subr.bf16.mxu0 %v437_v27 }
  0x4d   :  { %468 = vmatpush3.bf16.msra.mxu1 %v465_v40 }
  0x4e   :  { %440 = vmatpush3.bf16.msra.mxu0 %v437_v27  ;;  %470 = vmatprep.subr.bf16.mxu1 %v469_v43 }
  0x4f   :  { %442 = vmatprep.subr.bf16.mxu0 %v441_v30 }
  0x51   :  { %472 = vmatpush3.bf16.msra.mxu1 %v469_v43 }
  0x52   :  { %444 = vmatpush3.bf16.msra.mxu0 %v441_v30  ;;  %474 = vmatprep.subr.bf16.mxu1 %v473_v46 }
  0x53   :  { %446 = vmatprep.subr.bf16.mxu0 %v445_v33 }
  0x55   :  { %476 = vmatpush3.bf16.msra.mxu1 %v473_v46 }
  0x56   :  { %448 = vmatpush3.bf16.msra.mxu0 %v445_v33  ;;  %478 = vmatprep.subr.bf16.mxu1 %v477_v49 }
  0x59   :  { %380 = vmatmul.mubr.f32.vlgmr.msra.gmra.mrb[0].mxu0 %v69_v34  ;;  %480 = vmatpush3.bf16.msra.mxu1 %v477_v49 }
 0x12c   :  { %v381_v51 = vpop.f32.mrb[0].mxu0 }
 0x12d   :  { %v165_v52 = vadd.f32 %v381_v51, %v309_v50  ;;  %v159_v53 = vpop.f32.mrb[1].mxu0 }
 0x12e   :  { %v160_v54 = vadd.f32 %v309_v50, %v159_v53 }
 0x12f   :  { %v171_v55 = vmul.f32 0.70710677, %v165_v52  ;;  %v169_v62 = vmul.f32 0.5, %v165_v52 }
 0x130   :  { %v170_v56 = vmul.f32 0.70710677, %v160_v54  ;;  %v168_v60 = vmul.f32 0.5, %v160_v54 }
 0x131   :  { %488 = verf.f32 %v171_v55 }
 0x132   :  { %490 = verf.f32 %v170_v56 }
 0x13b   :  { %v489_v57 = vpop.eup %488 }
 0x13c   :  { %v491_v58 = vpop.eup %490  ;;  %v175_v59 = vadd.f32 1.0, %v489_v57 }
 0x13d   :  { %v174_v61 = vadd.f32 1.0, %v491_v58 }
 0x13e   :  { %v177_v0 = vmul.f32 %v175_v59, %v169_v62 }
 0x13f   :  { %v176_v63 = vmul.f32 %v174_v61, %v168_v60 }
 0x141   :  { %414 = vmatprep.mubr.f32.mxu1 %v176_v63 }
 0x142   :  { %415 = vmatmul.mubr.f32.vlgmr.msra.gmra.mrb[0].mxu1 %v177_v0 }
 0x215   :  { %v416_v1 = vpop.f32.mrb[0].mxu1 }
 0x216   :  { %v262_v3 = vpop.f32.mrb[1].mxu1  ;;  %v288_v4 = vadd.f32 %v416_v1, %v310_v2 }
 0x217   :  { %v287_v5 = vadd.f32 %v310_v2, %v262_v3 }
 0x218   :  { %290 = vst [vmem:[#allocation8 + $0x8] sm:$0xff] %v288_v4 }
 0x219   :  { %289 = vst [vmem:[#allocation8] sm:$0xff] %v287_v5 }
 0x21a   :  { %569 = shalt.err (!%p566_p0)
}
 0x21b   :  { %s570_s13 = scalar_lea.hbm %s700_s5, 256 }
 0x21c   :  { %p571_p1 = scmp.ne.s32.totalorder %s700_s5, %s570_s13  ;;  %p574_p2 = scmp.lt.u32.totalorder %s570_s13, %s700_s5 }
 0x21e   :  { %p576_p3 = pnand %p574_p2, %p571_p1 }
 0x220   :  { %579 = shalt.err (!%p576_p3)
}
 0x221   :  { %302 = dma.vmem_to_hbm [thread:$0]  %s297_s9, 256, %s700_s5, [#allocation4], %s588_s30, %s588_s30, %s589_s6  }
 0x222   :  { %584 = dma.done.wait [#allocation4], 256  }
 0x223   :  { %585 = vsyncadd [#allocation4], 4294967040 }
 0x224   :  { %306 = vsyncpa [#allocation3], 1 }
 0x225   :  { %307 = vsyncpa [#allocation6], 1 }
 0x226   :  { %308 = vsyncpa [#allocation4], 1 }

</bundles_post_ra>
